<compile_context>
chip_gen: v7x
topology: tpu7x:2x2x1
jax: 0.10.0
libtpu: 0.0.40
codegen_flags: <defaults>
</compile_context>

<pallas_src>
import functools

import numpy as np
import jax
import jax.numpy as jnp
from jax import lax
from jax.experimental import pallas as pl
from jax.experimental.pallas import tpu as pltpu


def _quantizer_kernel(feats_ref, fmin_ref, fmax_ref, bins_ref, regs_ref, *, nbins):
    """One (V, TN) tile: variables on sublanes, samples on lanes (lane-dense)."""
    feat = feats_ref[...]                                  # (V, TN) f32
    fmin = fmin_ref[...]                                   # (V, 1)  f32
    fmax = fmax_ref[...]                                   # (V, 1)  f32
    V, TN = feat.shape

    step = (fmax - fmin) / jnp.float32(nbins - 1)          # (V, 1)
    # Exact reciprocal on the tiny (V,1) tile; the (V,TN) divide becomes a VPU
    # multiply.  step == 0 (constant feature) -> inf/NaN in reg, the same
    # degenerate behavior as the PyTorch module.
    inv_step = jnp.float32(1.0) / step                     # (V, 1)

    # Hoist every (V,1)->(V,TN) broadcast out of the bin loop.
    step_t = jnp.broadcast_to(step, (V, TN))
    inv_step_t = jnp.broadcast_to(inv_step, (V, TN))
    base = fmin - feat                                     # (V, TN) == lin[0] - feat

    neg_inf = jnp.float32(-jnp.inf)
    scale = jnp.float32(1e6)

    def body(j, carry):
        best_val, best_idx = carry
        jf = j.astype(jnp.float32)
        diff_j = base + jf * step_t                        # lin[j] - feat, streamed
        # np.around(., 6) only influences the bin choice, and the argmax is
        # invariant to the positive 1e6 scale, so the /1e6 is dropped.
        r = lax.round(diff_j * scale, lax.RoundingMethod.TO_NEAREST_EVEN)
        # PyTorch overwrites positive diffs with the *global* per-variable min
        # before the argmax.  Any sentinel <= every diff (-inf) produces the
        # same first-occurrence argmax, which removes the cross-sample
        # dependency and makes sample-tiling exact.  (NaN feats never win and
        # land in bin 0, same hazard class as the original.)
        cand = jnp.where(r > 0, neg_inf, r)
        take = cand > best_val                             # strict ">" == first occurrence
        return jnp.where(take, cand, best_val), jnp.where(take, j, best_idx)

    init = (jnp.full((V, TN), neg_inf, jnp.float32),
            jnp.zeros((V, TN), jnp.int32))
    _, bins = lax.fori_loop(0, nbins, body, init,
                            unroll=True if nbins <= 64 else 8)

    # lin[bins] analytically: feat - lin[bins] == -(base + bins * step).
    reg = jnp.maximum(-(base + bins.astype(jnp.float32) * step_t),
                      jnp.float32(0.0)) * inv_step_t

    # TODO(synk): PyTorch emits int64 ("long") bins; TPU/JAX uses int32 here.
    bins_ref[...] = bins
    regs_ref[...] = reg


def _pick_sample_tile(n, v):
    """Largest lane-dense sample tile that keeps ~a dozen (V, TN) f32 live
    buffers plus double-buffered I/O comfortably inside the 32 MiB scoped-VMEM
    default (safe on v5e / v6e / v7x)."""
    cand = (262144 // max(v, 1)) // 128 * 128     # ~1 MiB per (V, TN) f32 buffer
    cand = max(128, min(2048, cand))
    if cand >= n:
        return n                                  # single full-extent block (always legal)
    return cand                                   # multiple of 128; partial tail block OK


def quantize(feats, fmin, fmax, nbins):
    """Pallas-backed Quantizer.forward (post-setup). Returns (bins, regs)."""
    feats = jnp.asarray(feats, jnp.float32)
    N, V = feats.shape
    nbins = int(nbins)

    # Lane-dense layout: samples on the 128-wide lane axis (wrapper-side
    # transpose is layout plumbing; V is typically << 128).
    x = feats.T                                            # (V, N)
    fmin_c = jnp.asarray(fmin, jnp.float32).reshape(V, 1)
    fmax_c = jnp.asarray(fmax, jnp.float32).reshape(V, 1)

    tn = _pick_sample_tile(N, V)
    grid = (pl.cdiv(N, tn),)

    kernel = functools.partial(_quantizer_kernel, nbins=nbins)
    bins_t, regs_t = pl.pallas_call(
        kernel,
        out_shape=(jax.ShapeDtypeStruct((V, N), jnp.int32),
                   jax.ShapeDtypeStruct((V, N), jnp.float32)),
        grid=grid,
        in_specs=[pl.BlockSpec((V, tn), lambda i: (0, i)),
                  pl.BlockSpec((V, 1), lambda i: (0, 0)),
                  pl.BlockSpec((V, 1), lambda i: (0, 0))],
        out_specs=(pl.BlockSpec((V, tn), lambda i: (0, i)),
                   pl.BlockSpec((V, tn), lambda i: (0, i))),
        compiler_params=pltpu.CompilerParams(
            dimension_semantics=("parallel",),
            vmem_limit_bytes=32 * 1024 * 1024),
    )(x, fmin_c, fmax_c)

    return bins_t.T, regs_t.T


class Quantizer:
    """JAX mirror of the PyTorch module (buffers held as arrays)."""

    def __init__(self, nbins, nvars):
        self.nbins = int(nbins)
        self.fmin = jnp.zeros((nvars,), jnp.float32)
        self.fmax = jnp.zeros((nvars,), jnp.float32)
        self.setup = True

    def forward(self, feats):
        if self.setup:
            # glue: buffer update, matches the torch setup branch
            self.fmin = feats.min(axis=0)
            self.fmax = feats.max(axis=0)
            self.setup = False
        return quantize(feats, self.fmin, self.fmax, self.nbins)


def _reference_forward(feats, fmin, fmax, nbins):
    """Numpy mirror of the PyTorch forward (post-setup), f32 throughout."""
    feats = np.asarray(feats, np.float32)
    fmin = np.asarray(fmin, np.float32)
    fmax = np.asarray(fmax, np.float32)
    N, V = feats.shape
    bins = np.zeros((N, V), np.int64)
    regs = np.zeros((N, V), np.float32)
    one_m = np.float32(1e6)
    for v in range(V):
        step = np.float32((fmax[v] - fmin[v]) / np.float32(nbins - 1))
        lin = (fmin[v] + np.arange(nbins, dtype=np.float32) * step).astype(np.float32)
        diff = (lin[None, :] - feats[:, v:v + 1]).astype(np.float32)
        diff = (np.round(diff * one_m) / one_m).astype(np.float32)   # half-even
        dmin = diff.min()
        diff = np.where(diff > 0, dmin, diff)
        b = diff.argmax(1)
        reg = np.clip(feats[:, v] - lin[b], 0.0, None) / step
        bins[:, v] = b
        regs[:, v] = reg
    return bins, regs


if __name__ == "__main__":
    NBINS = 16
    key = jax.random.PRNGKey(0)
    k1, k2 = jax.random.split(key)

    # Small shape consistent with the module contract: feats is (nsamples, nvars).
    N, NVARS = 8, 4
    feats = jax.random.uniform(k1, (N, NVARS), dtype=jnp.float32)

    q = Quantizer(NBINS, NVARS)
    bins, regs = jax.block_until_ready(q.forward(feats))

    feats_np = np.asarray(feats, np.float32)
    fmin_np = np.asarray(q.fmin, np.float32)
    fmax_np = np.asarray(q.fmax, np.float32)
    step_np = (fmax_np - fmin_np) / np.float32(NBINS - 1)

    bins_np = np.asarray(bins)
    regs_np = np.asarray(regs)
    assert bins_np.dtype == np.int32 and bins_np.shape == (N, NVARS)
    assert regs_np.dtype == np.float32 and regs_np.shape == (N, NVARS)
    assert bins_np.min() >= 0 and bins_np.max() <= NBINS - 1
    assert (regs_np >= 0.0).all()

    # Exact-semantics reference comparison.
    ref_bins, ref_regs = _reference_forward(feats_np, fmin_np, fmax_np, NBINS)
    assert (bins_np == ref_bins).all(), "bin mismatch vs reference"
    np.testing.assert_allclose(regs_np, ref_regs, rtol=1e-4, atol=1e-4)

    # invert()-style reconstruction: lin[bin] + reg*step == feat
    recon = fmin_np[None, :] + bins_np.astype(np.float32) * step_np[None, :] \
        + regs_np * step_np[None, :]
    np.testing.assert_allclose(recon, feats_np, rtol=1e-4, atol=1e-4)

    # Larger run to exercise the multi-tile, lane-dense sample grid path.
    N2 = 4096
    feats2 = jax.random.uniform(k2, (N2, NVARS), dtype=jnp.float32)
    fmin2 = feats2.min(axis=0)
    fmax2 = feats2.max(axis=0)
    bins2, regs2 = jax.block_until_ready(quantize(feats2, fmin2, fmax2, NBINS))
    bins2_np = np.asarray(bins2)
    regs2_np = np.asarray(regs2)
    step2_np = (np.asarray(fmax2) - np.asarray(fmin2)) / np.float32(NBINS - 1)
    assert bins2_np.min() >= 0 and bins2_np.max() <= NBINS - 1
    assert (regs2_np >= 0.0).all()
    recon2 = np.asarray(fmin2)[None, :] + bins2_np.astype(np.float32) * step2_np[None, :] \
        + regs2_np * step2_np[None, :]
    np.testing.assert_allclose(recon2, np.asarray(feats2), rtol=1e-4, atol=1e-4)

    print("KERNEL_OK")
</pallas_src>

<mosaic_0001>
module attributes {stable_mosaic.version = 11 : i64} {
  func.func @_quantizer_kernel(%arg0: i32, %arg1: memref<4x8xf32, #tpu.memory_space<vmem>>, %arg2: memref<4x1xf32, #tpu.memory_space<vmem>>, %arg3: memref<4x1xf32, #tpu.memory_space<vmem>>, %arg4: memref<4x8xi32, #tpu.memory_space<vmem>>, %arg5: memref<4x8xf32, #tpu.memory_space<vmem>>) attributes {dimension_semantics = [#tpu.dimension_semantics<parallel>], iteration_bounds = array<i64: 1>, scalar_prefetch = 0 : i64, scratch_operands = 0 : i64, tpu.core_type = #tpu.core_type<tc>, window_params = [{transform_indices = @transform_0, window_bounds = array<i64: 4, 8>}, {pipeline_mode = #tpu.pipeline_mode<synchronous>, transform_indices = @transform_1, window_bounds = array<i64: 4, 1>}, {pipeline_mode = #tpu.pipeline_mode<synchronous>, transform_indices = @transform_2, window_bounds = array<i64: 4, 1>}, {transform_indices = @transform_3, window_bounds = array<i64: 4, 8>}, {transform_indices = @transform_4, window_bounds = array<i64: 4, 8>}]} {
    %c0 = arith.constant 0 : index
    %c0_0 = arith.constant 0 : index
    %0 = vector.load %arg1[%c0, %c0_0] : memref<4x8xf32, #tpu.memory_space<vmem>>, vector<4x8xf32>
    %c0_1 = arith.constant 0 : index
    %c0_2 = arith.constant 0 : index
    %1 = vector.load %arg2[%c0_1, %c0_2] : memref<4x1xf32, #tpu.memory_space<vmem>>, vector<4x1xf32>
    %c0_3 = arith.constant 0 : index
    %c0_4 = arith.constant 0 : index
    %2 = vector.load %arg3[%c0_3, %c0_4] : memref<4x1xf32, #tpu.memory_space<vmem>>, vector<4x1xf32>
    %3 = arith.subf %2, %1 : vector<4x1xf32>
    %cst = arith.constant 1.500000e+01 : f32
    %4 = vector.broadcast %cst : f32 to vector<4x1xf32>
    %5 = arith.divf %3, %4 : vector<4x1xf32>
    %cst_5 = arith.constant 1.000000e+00 : f32
    %6 = vector.broadcast %cst_5 : f32 to vector<4x1xf32>
    %7 = arith.divf %6, %5 : vector<4x1xf32>
    %8 = vector.shape_cast %5 : vector<4x1xf32> to vector<4x1xf32>
    %9 = vector.broadcast %8 : vector<4x1xf32> to vector<4x8xf32>
    %10 = vector.shape_cast %7 : vector<4x1xf32> to vector<4x1xf32>
    %11 = vector.broadcast %10 : vector<4x1xf32> to vector<4x8xf32>
    %12 = vector.broadcast %1 : vector<4x1xf32> to vector<4x8xf32>
    %13 = arith.subf %12, %0 : vector<4x8xf32>
    %cst_6 = arith.constant 0xFF800000 : f32
    %14 = vector.broadcast %cst_6 : f32 to vector<4x8xf32>
    %c0_i32 = arith.constant 0 : i32
    %15 = vector.broadcast %c0_i32 : i32 to vector<4x8xi32>
    %cst_7 = arith.constant 1.000000e+06 : f32
    %cst_8 = arith.constant 0xFF800000 : f32
    %c0_i32_9 = arith.constant 0 : i32
    %16 = arith.sitofp %c0_i32_9 : i32 to f32
    %17 = vector.broadcast %16 : f32 to vector<4x8xf32>
    %18 = arith.mulf %17, %9 : vector<4x8xf32>
    %19 = arith.addf %13, %18 : vector<4x8xf32>
    %20 = vector.broadcast %cst_7 : f32 to vector<4x8xf32>
    %21 = arith.mulf %19, %20 : vector<4x8xf32>
    %22 = math.roundeven %21 : vector<4x8xf32>
    %cst_10 = arith.constant 0.000000e+00 : f32
    %23 = vector.broadcast %cst_10 : f32 to vector<4x8xf32>
    %24 = arith.cmpf ogt, %22, %23 : vector<4x8xf32>
    %25 = vector.broadcast %cst_8 : f32 to vector<4x8xf32>
    %26 = arith.select %24, %25, %22 : vector<4x8xi1>, vector<4x8xf32>
    %27 = arith.cmpf ogt, %26, %14 : vector<4x8xf32>
    %28 = arith.select %27, %26, %14 : vector<4x8xi1>, vector<4x8xf32>
    %29 = vector.broadcast %c0_i32_9 : i32 to vector<4x8xi32>
    %30 = arith.select %27, %29, %15 : vector<4x8xi1>, vector<4x8xi32>
    %c1_i32 = arith.constant 1 : i32
    %31 = arith.sitofp %c1_i32 : i32 to f32
    %32 = vector.broadcast %31 : f32 to vector<4x8xf32>
    %33 = arith.mulf %32, %9 : vector<4x8xf32>
    %34 = arith.addf %13, %33 : vector<4x8xf32>
    %35 = vector.broadcast %cst_7 : f32 to vector<4x8xf32>
    %36 = arith.mulf %34, %35 : vector<4x8xf32>
    %37 = math.roundeven %36 : vector<4x8xf32>
    %cst_11 = arith.constant 0.000000e+00 : f32
    %38 = vector.broadcast %cst_11 : f32 to vector<4x8xf32>
    %39 = arith.cmpf ogt, %37, %38 : vector<4x8xf32>
    %40 = vector.broadcast %cst_8 : f32 to vector<4x8xf32>
    %41 = arith.select %39, %40, %37 : vector<4x8xi1>, vector<4x8xf32>
    %42 = arith.cmpf ogt, %41, %28 : vector<4x8xf32>
    %43 = arith.select %42, %41, %28 : vector<4x8xi1>, vector<4x8xf32>
    %44 = vector.broadcast %c1_i32 : i32 to vector<4x8xi32>
    %45 = arith.select %42, %44, %30 : vector<4x8xi1>, vector<4x8xi32>
    %c2_i32 = arith.constant 2 : i32
    %46 = arith.sitofp %c2_i32 : i32 to f32
    %47 = vector.broadcast %46 : f32 to vector<4x8xf32>
    %48 = arith.mulf %47, %9 : vector<4x8xf32>
    %49 = arith.addf %13, %48 : vector<4x8xf32>
    %50 = vector.broadcast %cst_7 : f32 to vector<4x8xf32>
    %51 = arith.mulf %49, %50 : vector<4x8xf32>
    %52 = math.roundeven %51 : vector<4x8xf32>
    %cst_12 = arith.constant 0.000000e+00 : f32
    %53 = vector.broadcast %cst_12 : f32 to vector<4x8xf32>
    %54 = arith.cmpf ogt, %52, %53 : vector<4x8xf32>
    %55 = vector.broadcast %cst_8 : f32 to vector<4x8xf32>
    %56 = arith.select %54, %55, %52 : vector<4x8xi1>, vector<4x8xf32>
    %57 = arith.cmpf ogt, %56, %43 : vector<4x8xf32>
    %58 = arith.select %57, %56, %43 : vector<4x8xi1>, vector<4x8xf32>
    %59 = vector.broadcast %c2_i32 : i32 to vector<4x8xi32>
    %60 = arith.select %57, %59, %45 : vector<4x8xi1>, vector<4x8xi32>
    %c3_i32 = arith.constant 3 : i32
    %61 = arith.sitofp %c3_i32 : i32 to f32
    %62 = vector.broadcast %61 : f32 to vector<4x8xf32>
    %63 = arith.mulf %62, %9 : vector<4x8xf32>
    %64 = arith.addf %13, %63 : vector<4x8xf32>
    %65 = vector.broadcast %cst_7 : f32 to vector<4x8xf32>
    %66 = arith.mulf %64, %65 : vector<4x8xf32>
    %67 = math.roundeven %66 : vector<4x8xf32>
    %cst_13 = arith.constant 0.000000e+00 : f32
    %68 = vector.broadcast %cst_13 : f32 to vector<4x8xf32>
    %69 = arith.cmpf ogt, %67, %68 : vector<4x8xf32>
    %70 = vector.broadcast %cst_8 : f32 to vector<4x8xf32>
    %71 = arith.select %69, %70, %67 : vector<4x8xi1>, vector<4x8xf32>
    %72 = arith.cmpf ogt, %71, %58 : vector<4x8xf32>
    %73 = arith.select %72, %71, %58 : vector<4x8xi1>, vector<4x8xf32>
    %74 = vector.broadcast %c3_i32 : i32 to vector<4x8xi32>
    %75 = arith.select %72, %74, %60 : vector<4x8xi1>, vector<4x8xi32>
    %c4_i32 = arith.constant 4 : i32
    %76 = arith.sitofp %c4_i32 : i32 to f32
    %77 = vector.broadcast %76 : f32 to vector<4x8xf32>
    %78 = arith.mulf %77, %9 : vector<4x8xf32>
    %79 = arith.addf %13, %78 : vector<4x8xf32>
    %80 = vector.broadcast %cst_7 : f32 to vector<4x8xf32>
    %81 = arith.mulf %79, %80 : vector<4x8xf32>
    %82 = math.roundeven %81 : vector<4x8xf32>
    %cst_14 = arith.constant 0.000000e+00 : f32
    %83 = vector.broadcast %cst_14 : f32 to vector<4x8xf32>
    %84 = arith.cmpf ogt, %82, %83 : vector<4x8xf32>
    %85 = vector.broadcast %cst_8 : f32 to vector<4x8xf32>
    %86 = arith.select %84, %85, %82 : vector<4x8xi1>, vector<4x8xf32>
    %87 = arith.cmpf ogt, %86, %73 : vector<4x8xf32>
    %88 = arith.select %87, %86, %73 : vector<4x8xi1>, vector<4x8xf32>
    %89 = vector.broadcast %c4_i32 : i32 to vector<4x8xi32>
    %90 = arith.select %87, %89, %75 : vector<4x8xi1>, vector<4x8xi32>
    %c5_i32 = arith.constant 5 : i32
    %91 = arith.sitofp %c5_i32 : i32 to f32
    %92 = vector.broadcast %91 : f32 to vector<4x8xf32>
    %93 = arith.mulf %92, %9 : vector<4x8xf32>
    %94 = arith.addf %13, %93 : vector<4x8xf32>
    %95 = vector.broadcast %cst_7 : f32 to vector<4x8xf32>
    %96 = arith.mulf %94, %95 : vector<4x8xf32>
    %97 = math.roundeven %96 : vector<4x8xf32>
    %cst_15 = arith.constant 0.000000e+00 : f32
    %98 = vector.broadcast %cst_15 : f32 to vector<4x8xf32>
    %99 = arith.cmpf ogt, %97, %98 : vector<4x8xf32>
    %100 = vector.broadcast %cst_8 : f32 to vector<4x8xf32>
    %101 = arith.select %99, %100, %97 : vector<4x8xi1>, vector<4x8xf32>
    %102 = arith.cmpf ogt, %101, %88 : vector<4x8xf32>
    %103 = arith.select %102, %101, %88 : vector<4x8xi1>, vector<4x8xf32>
    %104 = vector.broadcast %c5_i32 : i32 to vector<4x8xi32>
    %105 = arith.select %102, %104, %90 : vector<4x8xi1>, vector<4x8xi32>
    %c6_i32 = arith.constant 6 : i32
    %106 = arith.sitofp %c6_i32 : i32 to f32
    %107 = vector.broadcast %106 : f32 to vector<4x8xf32>
    %108 = arith.mulf %107, %9 : vector<4x8xf32>
    %109 = arith.addf %13, %108 : vector<4x8xf32>
    %110 = vector.broadcast %cst_7 : f32 to vector<4x8xf32>
    %111 = arith.mulf %109, %110 : vector<4x8xf32>
    %112 = math.roundeven %111 : vector<4x8xf32>
    %cst_16 = arith.constant 0.000000e+00 : f32
    %113 = vector.broadcast %cst_16 : f32 to vector<4x8xf32>
    %114 = arith.cmpf ogt, %112, %113 : vector<4x8xf32>
    %115 = vector.broadcast %cst_8 : f32 to vector<4x8xf32>
    %116 = arith.select %114, %115, %112 : vector<4x8xi1>, vector<4x8xf32>
    %117 = arith.cmpf ogt, %116, %103 : vector<4x8xf32>
    %118 = arith.select %117, %116, %103 : vector<4x8xi1>, vector<4x8xf32>
    %119 = vector.broadcast %c6_i32 : i32 to vector<4x8xi32>
    %120 = arith.select %117, %119, %105 : vector<4x8xi1>, vector<4x8xi32>
    %c7_i32 = arith.constant 7 : i32
    %121 = arith.sitofp %c7_i32 : i32 to f32
    %122 = vector.broadcast %121 : f32 to vector<4x8xf32>
    %123 = arith.mulf %122, %9 : vector<4x8xf32>
    %124 = arith.addf %13, %123 : vector<4x8xf32>
    %125 = vector.broadcast %cst_7 : f32 to vector<4x8xf32>
    %126 = arith.mulf %124, %125 : vector<4x8xf32>
    %127 = math.roundeven %126 : vector<4x8xf32>
    %cst_17 = arith.constant 0.000000e+00 : f32
    %128 = vector.broadcast %cst_17 : f32 to vector<4x8xf32>
    %129 = arith.cmpf ogt, %127, %128 : vector<4x8xf32>
    %130 = vector.broadcast %cst_8 : f32 to vector<4x8xf32>
    %131 = arith.select %129, %130, %127 : vector<4x8xi1>, vector<4x8xf32>
    %132 = arith.cmpf ogt, %131, %118 : vector<4x8xf32>
    %133 = arith.select %132, %131, %118 : vector<4x8xi1>, vector<4x8xf32>
    %134 = vector.broadcast %c7_i32 : i32 to vector<4x8xi32>
    %135 = arith.select %132, %134, %120 : vector<4x8xi1>, vector<4x8xi32>
    %c8_i32 = arith.constant 8 : i32
    %136 = arith.sitofp %c8_i32 : i32 to f32
    %137 = vector.broadcast %136 : f32 to vector<4x8xf32>
    %138 = arith.mulf %137, %9 : vector<4x8xf32>
    %139 = arith.addf %13, %138 : vector<4x8xf32>
    %140 = vector.broadcast %cst_7 : f32 to vector<4x8xf32>
    %141 = arith.mulf %139, %140 : vector<4x8xf32>
    %142 = math.roundeven %141 : vector<4x8xf32>
    %cst_18 = arith.constant 0.000000e+00 : f32
    %143 = vector.broadcast %cst_18 : f32 to vector<4x8xf32>
    %144 = arith.cmpf ogt, %142, %143 : vector<4x8xf32>
    %145 = vector.broadcast %cst_8 : f32 to vector<4x8xf32>
    %146 = arith.select %144, %145, %142 : vector<4x8xi1>, vector<4x8xf32>
    %147 = arith.cmpf ogt, %146, %133 : vector<4x8xf32>
    %148 = arith.select %147, %146, %133 : vector<4x8xi1>, vector<4x8xf32>
    %149 = vector.broadcast %c8_i32 : i32 to vector<4x8xi32>
    %150 = arith.select %147, %149, %135 : vector<4x8xi1>, vector<4x8xi32>
    %c9_i32 = arith.constant 9 : i32
    %151 = arith.sitofp %c9_i32 : i32 to f32
    %152 = vector.broadcast %151 : f32 to vector<4x8xf32>
    %153 = arith.mulf %152, %9 : vector<4x8xf32>
    %154 = arith.addf %13, %153 : vector<4x8xf32>
    %155 = vector.broadcast %cst_7 : f32 to vector<4x8xf32>
    %156 = arith.mulf %154, %155 : vector<4x8xf32>
    %157 = math.roundeven %156 : vector<4x8xf32>
    %cst_19 = arith.constant 0.000000e+00 : f32
    %158 = vector.broadcast %cst_19 : f32 to vector<4x8xf32>
    %159 = arith.cmpf ogt, %157, %158 : vector<4x8xf32>
    %160 = vector.broadcast %cst_8 : f32 to vector<4x8xf32>
    %161 = arith.select %159, %160, %157 : vector<4x8xi1>, vector<4x8xf32>
    %162 = arith.cmpf ogt, %161, %148 : vector<4x8xf32>
    %163 = arith.select %162, %161, %148 : vector<4x8xi1>, vector<4x8xf32>
    %164 = vector.broadcast %c9_i32 : i32 to vector<4x8xi32>
    %165 = arith.select %162, %164, %150 : vector<4x8xi1>, vector<4x8xi32>
    %c10_i32 = arith.constant 10 : i32
    %166 = arith.sitofp %c10_i32 : i32 to f32
    %167 = vector.broadcast %166 : f32 to vector<4x8xf32>
    %168 = arith.mulf %167, %9 : vector<4x8xf32>
    %169 = arith.addf %13, %168 : vector<4x8xf32>
    %170 = vector.broadcast %cst_7 : f32 to vector<4x8xf32>
    %171 = arith.mulf %169, %170 : vector<4x8xf32>
    %172 = math.roundeven %171 : vector<4x8xf32>
    %cst_20 = arith.constant 0.000000e+00 : f32
    %173 = vector.broadcast %cst_20 : f32 to vector<4x8xf32>
    %174 = arith.cmpf ogt, %172, %173 : vector<4x8xf32>
    %175 = vector.broadcast %cst_8 : f32 to vector<4x8xf32>
    %176 = arith.select %174, %175, %172 : vector<4x8xi1>, vector<4x8xf32>
    %177 = arith.cmpf ogt, %176, %163 : vector<4x8xf32>
    %178 = arith.select %177, %176, %163 : vector<4x8xi1>, vector<4x8xf32>
    %179 = vector.broadcast %c10_i32 : i32 to vector<4x8xi32>
    %180 = arith.select %177, %179, %165 : vector<4x8xi1>, vector<4x8xi32>
    %c11_i32 = arith.constant 11 : i32
    %181 = arith.sitofp %c11_i32 : i32 to f32
    %182 = vector.broadcast %181 : f32 to vector<4x8xf32>
    %183 = arith.mulf %182, %9 : vector<4x8xf32>
    %184 = arith.addf %13, %183 : vector<4x8xf32>
    %185 = vector.broadcast %cst_7 : f32 to vector<4x8xf32>
    %186 = arith.mulf %184, %185 : vector<4x8xf32>
    %187 = math.roundeven %186 : vector<4x8xf32>
    %cst_21 = arith.constant 0.000000e+00 : f32
    %188 = vector.broadcast %cst_21 : f32 to vector<4x8xf32>
    %189 = arith.cmpf ogt, %187, %188 : vector<4x8xf32>
    %190 = vector.broadcast %cst_8 : f32 to vector<4x8xf32>
    %191 = arith.select %189, %190, %187 : vector<4x8xi1>, vector<4x8xf32>
    %192 = arith.cmpf ogt, %191, %178 : vector<4x8xf32>
    %193 = arith.select %192, %191, %178 : vector<4x8xi1>, vector<4x8xf32>
    %194 = vector.broadcast %c11_i32 : i32 to vector<4x8xi32>
    %195 = arith.select %192, %194, %180 : vector<4x8xi1>, vector<4x8xi32>
    %c12_i32 = arith.constant 12 : i32
    %196 = arith.sitofp %c12_i32 : i32 to f32
    %197 = vector.broadcast %196 : f32 to vector<4x8xf32>
    %198 = arith.mulf %197, %9 : vector<4x8xf32>
    %199 = arith.addf %13, %198 : vector<4x8xf32>
    %200 = vector.broadcast %cst_7 : f32 to vector<4x8xf32>
    %201 = arith.mulf %199, %200 : vector<4x8xf32>
    %202 = math.roundeven %201 : vector<4x8xf32>
    %cst_22 = arith.constant 0.000000e+00 : f32
    %203 = vector.broadcast %cst_22 : f32 to vector<4x8xf32>
    %204 = arith.cmpf ogt, %202, %203 : vector<4x8xf32>
    %205 = vector.broadcast %cst_8 : f32 to vector<4x8xf32>
    %206 = arith.select %204, %205, %202 : vector<4x8xi1>, vector<4x8xf32>
    %207 = arith.cmpf ogt, %206, %193 : vector<4x8xf32>
    %208 = arith.select %207, %206, %193 : vector<4x8xi1>, vector<4x8xf32>
    %209 = vector.broadcast %c12_i32 : i32 to vector<4x8xi32>
    %210 = arith.select %207, %209, %195 : vector<4x8xi1>, vector<4x8xi32>
    %c13_i32 = arith.constant 13 : i32
    %211 = arith.sitofp %c13_i32 : i32 to f32
    %212 = vector.broadcast %211 : f32 to vector<4x8xf32>
    %213 = arith.mulf %212, %9 : vector<4x8xf32>
    %214 = arith.addf %13, %213 : vector<4x8xf32>
    %215 = vector.broadcast %cst_7 : f32 to vector<4x8xf32>
    %216 = arith.mulf %214, %215 : vector<4x8xf32>
    %217 = math.roundeven %216 : vector<4x8xf32>
    %cst_23 = arith.constant 0.000000e+00 : f32
    %218 = vector.broadcast %cst_23 : f32 to vector<4x8xf32>
    %219 = arith.cmpf ogt, %217, %218 : vector<4x8xf32>
    %220 = vector.broadcast %cst_8 : f32 to vector<4x8xf32>
    %221 = arith.select %219, %220, %217 : vector<4x8xi1>, vector<4x8xf32>
    %222 = arith.cmpf ogt, %221, %208 : vector<4x8xf32>
    %223 = arith.select %222, %221, %208 : vector<4x8xi1>, vector<4x8xf32>
    %224 = vector.broadcast %c13_i32 : i32 to vector<4x8xi32>
    %225 = arith.select %222, %224, %210 : vector<4x8xi1>, vector<4x8xi32>
    %c14_i32 = arith.constant 14 : i32
    %226 = arith.sitofp %c14_i32 : i32 to f32
    %227 = vector.broadcast %226 : f32 to vector<4x8xf32>
    %228 = arith.mulf %227, %9 : vector<4x8xf32>
    %229 = arith.addf %13, %228 : vector<4x8xf32>
    %230 = vector.broadcast %cst_7 : f32 to vector<4x8xf32>
    %231 = arith.mulf %229, %230 : vector<4x8xf32>
    %232 = math.roundeven %231 : vector<4x8xf32>
    %cst_24 = arith.constant 0.000000e+00 : f32
    %233 = vector.broadcast %cst_24 : f32 to vector<4x8xf32>
    %234 = arith.cmpf ogt, %232, %233 : vector<4x8xf32>
    %235 = vector.broadcast %cst_8 : f32 to vector<4x8xf32>
    %236 = arith.select %234, %235, %232 : vector<4x8xi1>, vector<4x8xf32>
    %237 = arith.cmpf ogt, %236, %223 : vector<4x8xf32>
    %238 = arith.select %237, %236, %223 : vector<4x8xi1>, vector<4x8xf32>
    %239 = vector.broadcast %c14_i32 : i32 to vector<4x8xi32>
    %240 = arith.select %237, %239, %225 : vector<4x8xi1>, vector<4x8xi32>
    %c15_i32 = arith.constant 15 : i32
    %241 = arith.sitofp %c15_i32 : i32 to f32
    %242 = vector.broadcast %241 : f32 to vector<4x8xf32>
    %243 = arith.mulf %242, %9 : vector<4x8xf32>
    %244 = arith.addf %13, %243 : vector<4x8xf32>
    %245 = vector.broadcast %cst_7 : f32 to vector<4x8xf32>
    %246 = arith.mulf %244, %245 : vector<4x8xf32>
    %247 = math.roundeven %246 : vector<4x8xf32>
    %cst_25 = arith.constant 0.000000e+00 : f32
    %248 = vector.broadcast %cst_25 : f32 to vector<4x8xf32>
    %249 = arith.cmpf ogt, %247, %248 : vector<4x8xf32>
    %250 = vector.broadcast %cst_8 : f32 to vector<4x8xf32>
    %251 = arith.select %249, %250, %247 : vector<4x8xi1>, vector<4x8xf32>
    %252 = arith.cmpf ogt, %251, %238 : vector<4x8xf32>
    %253 = arith.select %252, %251, %238 : vector<4x8xi1>, vector<4x8xf32>
    %254 = vector.broadcast %c15_i32 : i32 to vector<4x8xi32>
    %255 = arith.select %252, %254, %240 : vector<4x8xi1>, vector<4x8xi32>
    %c16_i32 = arith.constant 16 : i32
    %256 = arith.sitofp %255 : vector<4x8xi32> to vector<4x8xf32>
    %257 = arith.mulf %256, %9 : vector<4x8xf32>
    %258 = arith.addf %13, %257 : vector<4x8xf32>
    %cst_26 = arith.constant 0.000000e+00 : f32
    %259 = vector.broadcast %cst_26 : f32 to vector<4x8xf32>
    %260 = arith.subf %259, %258 : vector<4x8xf32>
    %cst_27 = arith.constant 0.000000e+00 : f32
    %261 = vector.broadcast %cst_27 : f32 to vector<4x8xf32>
    %262 = arith.maximumf %260, %261 : vector<4x8xf32>
    %263 = arith.mulf %262, %11 : vector<4x8xf32>
    %c0_28 = arith.constant 0 : index
    %c0_29 = arith.constant 0 : index
    %264 = vector.load %arg4[%c0_28, %c0_29] : memref<4x8xi32, #tpu.memory_space<vmem>>, vector<4x8xi32>
    tpu.vector_store %arg4[%c0_28, %c0_29], %255 {strides = array<i32>} : memref<4x8xi32, #tpu.memory_space<vmem>>, vector<4x8xi32>,
    %c0_30 = arith.constant 0 : index
    %c0_31 = arith.constant 0 : index
    %265 = vector.load %arg5[%c0_30, %c0_31] : memref<4x8xf32, #tpu.memory_space<vmem>>, vector<4x8xf32>
    tpu.vector_store %arg5[%c0_30, %c0_31], %263 {strides = array<i32>} : memref<4x8xf32, #tpu.memory_space<vmem>>, vector<4x8xf32>,
    return
  }
  func.func @transform_0(%arg0: i32) -> (i32, i32) {
    %c0_i32 = arith.constant 0 : i32
    %c0_i32_0 = arith.constant 0 : i32
    return %c0_i32, %arg0 : i32, i32
  }
  func.func @transform_1(%arg0: i32) -> (i32, i32) {
    %c0_i32 = arith.constant 0 : i32
    %c0_i32_0 = arith.constant 0 : i32
    %c0_i32_1 = arith.constant 0 : i32
    return %c0_i32, %c0_i32_0 : i32, i32
  }
  func.func @transform_2(%arg0: i32) -> (i32, i32) {
    %c0_i32 = arith.constant 0 : i32
    %c0_i32_0 = arith.constant 0 : i32
    %c0_i32_1 = arith.constant 0 : i32
    return %c0_i32, %c0_i32_0 : i32, i32
  }
  func.func @transform_3(%arg0: i32) -> (i32, i32) {
    %c0_i32 = arith.constant 0 : i32
    %c0_i32_0 = arith.constant 0 : i32
    return %c0_i32, %arg0 : i32, i32
  }
  func.func @transform_4(%arg0: i32) -> (i32, i32) {
    %c0_i32 = arith.constant 0 : i32
    %c0_i32_0 = arith.constant 0 : i32
    return %c0_i32, %arg0 : i32, i32
  }
}

</mosaic_0001>

<bundles_post_ra>
// kernel: tpu_custom_call.1
= control target key start
LH: loop header
LB: loop body
LE: loop exit
PB: predicated region body
PF: predicated region fallthrough
CT: control target
= control target key end

     0   :  { %10 = vsyncpa [#allocation3], 0  ;;  %v291_v2 = vmov 0   ;;  %s395_s0 = inlined_call_operand.vmem [shape: f32[4,8], index: 0, kind: input, shape index: {}]   ;;  %s396_s1 = inlined_call_operand.vmem [shape: f32[4,1], index: 1, kind: input, shape index: {}]   ;;  %s397_s2 = inlined_call_operand.vmem [shape: f32[4,1], index: 2, kind: input, shape index: {}]   ;;  %s398_s3 = inlined_call_operand.hbm [shape: s32[4,8], index: 3, kind: output, shape index: {0}]   ;;  %s399_s4 = inlined_call_operand.hbm [shape: f32[4,8], index: 4, kind: output, shape index: {1}]  }
   0x1   :  { %v19_v0 = vld [vmem:[%s396_s1] sm:$0xf]  ;;  %239 = vset.pattern.permute.xlu0 %v291_v2  ;;  %240 = vset.pattern.permute.xlu1 %v291_v2 }
   0x2   :  { %v20_v1 = vld [vmem:[%s397_s2] sm:$0xf] }
   0x3   :  { %v21_v3 = vsub.f32 %v20_v1, %v19_v0 }
   0x4   :  { %11 = vsyncpa [#allocation5], 0  ;;  %v18_v7 = vld [vmem:[%s395_s0] sm:$0xf]  ;;  %s292_s0 = smov [#allocation2]  }
   0x5   :  { %v23_v4 = vmul.f32 0.06666667, %v21_v3  ;;  %s198_s2 = sshll.u32 %s292_s0, 4  ;;  %s199_s2 = int_to_ptr.vmem [resolvable:$true] %s198_s2 }
   0x6   :  { %s243_s20 = scalar_lea.vmem %s199_s2, 64  ;;  %p248_p1 = scmp.lt.s32.totalorder %s199_s2, %s199_s2 }
   0x7   :  { %28 = vperm.xlu0 %239, %v23_v4   ;;  %241 = vrcp.f32 %v23_v4  ;;  %p244_p0 = scmp.ne.s32.totalorder %s199_s2, %s243_s20  ;;  %p249_p2 = scmp.lt.s32.totalorder %s243_s20, %s243_s20 }
   0x9   :  { %p250_p3 = por %p249_p2, %p248_p1 }
   0xb   :  { %38 = vperm.xlu0 %239, %v19_v0   ;;  %p251_p4 = pnand %p250_p3, %p244_p0 }
  0x11   :  { %v242_v5 = vpop.eup %241 }
  0x12   :  { %33 = vperm.xlu1 %240, %v242_v5  }
  0x86   :  { %v327_v6 = vpop.permute.xlu0 %28 }
  0x87   :  { %v42_v10 = vmul.f32 0.0, %v327_v6  ;;  %v58_v11 = vmul.f32 2.0, %v327_v6  ;;  %v67_v12 = vmul.f32 3.0, %v327_v6  ;;  %v76_v13 = vmul.f32 4.0, %v327_v6 }
  0x88   :  { %v85_v14 = vmul.f32 5.0, %v327_v6  ;;  %v94_v15 = vmul.f32 6.0, %v327_v6  ;;  %v103_v26 = vmul.f32 7.0, %v327_v6  ;;  %v112_v27 = vmul.f32 8.0, %v327_v6 }
  0x89   :  { %v121_v28 = vmul.f32 9.0, %v327_v6  ;;  %v130_v34 = vmul.f32 10.0, %v327_v6  ;;  %v139_v35 = vmul.f32 11.0, %v327_v6  ;;  %v148_v40 = vmul.f32 12.0, %v327_v6 }
  0x8a   :  { %v39_v8 = vpop.permute.xlu0 %38  ;;  %v157_v41 = vmul.f32 13.0, %v327_v6  ;;  %v166_v49 = vmul.f32 14.0, %v327_v6  ;;  %v175_v61 = vmul.f32 15.0, %v327_v6 }
  0x8b   :  { %v332_v9 = vsub.f32 %v39_v8, %v18_v7 }
  0x8d   :  { %v43_v16 = vadd.f32 %v42_v10, %v332_v9  ;;  %v50_v17 = vadd.f32 %v332_v9, %v327_v6  ;;  %v59_v18 = vadd.f32 %v58_v11, %v332_v9  ;;  %v68_v19 = vadd.f32 %v67_v12, %v332_v9 }
  0x8e   :  { %v77_v20 = vadd.f32 %v76_v13, %v332_v9  ;;  %v86_v21 = vadd.f32 %v85_v14, %v332_v9  ;;  %v95_v25 = vadd.f32 %v94_v15, %v332_v9  ;;  %v104_v39 = vadd.f32 %v103_v26, %v332_v9 }
  0x8f   :  { %v44_v22 = vmul.f32 1000000.0, %v43_v16  ;;  %v51_v23 = vmul.f32 1000000.0, %v50_v17  ;;  %v60_v24 = vmul.f32 1000000.0, %v59_v18  ;;  %v113_v43 = vadd.f32 %v112_v27, %v332_v9 }
  0x90   :  { %v69_v29 = vmul.f32 1000000.0, %v68_v19  ;;  %v78_v33 = vmul.f32 1000000.0, %v77_v20  ;;  %v87_v37 = vmul.f32 1000000.0, %v86_v21  ;;  %v122_v45 = vadd.f32 %v121_v28, %v332_v9 }
  0x91   :  { %v220_v30 = vround.rtne.f32 %v44_v22  ;;  %v221_v31 = vround.rtne.f32 %v51_v23  ;;  %v222_v32 = vround.rtne.f32 %v60_v24  ;;  %v96_v38 = vmul.f32 1000000.0, %v95_v25 }
  0x92   :  { %v223_v36 = vround.rtne.f32 %v69_v29  ;;  %v224_v44 = vround.rtne.f32 %v78_v33  ;;  %v225_v48 = vround.rtne.f32 %v87_v37  ;;  %v105_v51 = vmul.f32 1000000.0, %v104_v39 }
  0x93   :  { %vm46_vm0 = vcmp.gt.f32.partialorder %v220_v30, 0.0  ;;  %vm53_vm1 = vcmp.gt.f32.partialorder %v221_v31, 0.0  ;;  %vm62_vm3 = vcmp.gt.f32.partialorder %v222_v32, 0.0  ;;  %v226_v50 = vround.rtne.f32 %v96_v38 }
  0x94   :  { %v47_v42 = vsel %vm46_vm0, -inf, %v220_v30  ;;  %v54_v47 = vsel %vm53_vm1, -inf, %v221_v31  ;;  %vm71_vm4 = vcmp.gt.f32.partialorder %v223_v36, 0.0  ;;  %v63_v54 = vsel %vm62_vm3, -inf, %v222_v32 }
  0x95   :  { %vm48_vm2 = vcmp.gt.f32.partialorder %v47_v42, -inf  ;;  %v114_v55 = vmul.f32 1000000.0, %v113_v43  ;;  %v72_v56 = vsel %vm71_vm4, -inf, %v223_v36  ;;  %vm80_vm7 = vcmp.gt.f32.partialorder %v224_v44, 0.0 }
  0x96   :  { %v49_v46 = vsel %vm48_vm2, %v47_v42, -inf  ;;  %v131_v57 = vadd.f32 %v130_v34, %v332_v9  ;;  %vm89_vm8 = vcmp.gt.f32.partialorder %v225_v48, 0.0  ;;  %v123_v60 = vmul.f32 1000000.0, %v122_v45 }
  0x97   :  { %vm55_vm5 = vcmp.gt.f32.partialorder %v54_v47, %v49_v46  ;;  %v227_v62 = vround.rtne.f32 %v105_v51  ;;  %v140_v63 = vadd.f32 %v139_v35, %v332_v9  ;;  %v228_v3 = vround.rtne.f32 %v114_v55 }
  0x98   :  { %v56_v52 = vsel %vm55_vm5, %v54_v47, %v49_v46  ;;  %v57_v53 = vsel %vm55_vm5, 1, %v291_v2  ;;  %v81_v2 = vsel %vm80_vm7, -inf, %v224_v44  ;;  %v90_v4 = vsel %vm89_vm8, -inf, %v225_v48 }
  0x99   :  { %vm64_vm6 = vcmp.gt.f32.partialorder %v63_v54, %v56_v52  ;;  %vm98_vm11 = vcmp.gt.f32.partialorder %v226_v50, 0.0  ;;  %v132_v5 = vmul.f32 1000000.0, %v131_v57  ;;  %v229_v10 = vround.rtne.f32 %v123_v60 }
  0x9a   :  { %v65_v58 = vsel %vm64_vm6, %v63_v54, %v56_v52  ;;  %v66_v59 = vsel %vm64_vm6, 2, %v57_v53  ;;  %v149_v11 = vadd.f32 %v148_v40, %v332_v9  ;;  %vm107_vm13 = vcmp.gt.f32.partialorder %v227_v62, 0.0 }
  0x9b   :  { %vm73_vm9 = vcmp.gt.f32.partialorder %v72_v56, %v65_v58  ;;  %v141_v12 = vmul.f32 1000000.0, %v140_v63  ;;  %v158_v13 = vadd.f32 %v157_v41, %v332_v9  ;;  %v99_v16 = vsel %vm98_vm11, -inf, %v226_v50 }
  0x9c   :  { %v74_v0 = vsel %vm73_vm9, %v72_v56, %v65_v58  ;;  %v75_v1 = vsel %vm73_vm9, 3, %v66_v59  ;;  %vm116_vm14 = vcmp.gt.f32.partialorder %v228_v3, 0.0  ;;  %v230_v17 = vround.rtne.f32 %v132_v5 }
  0x9d   :  { %vm82_vm10 = vcmp.gt.f32.partialorder %v81_v2, %v74_v0  ;;  %v150_v18 = vmul.f32 1000000.0, %v149_v11  ;;  %v167_v19 = vadd.f32 %v166_v49, %v332_v9  ;;  %v108_v22 = vsel %vm107_vm13, -inf, %v227_v62 }
  0x9e   :  { %v83_v7 = vsel %vm82_vm10, %v81_v2, %v74_v0  ;;  %v84_v8 = vsel %vm82_vm10, 4, %v75_v1  ;;  %vm125_vm0 = vcmp.gt.f32.partialorder %v229_v10, 0.0  ;;  %v231_v23 = vround.rtne.f32 %v141_v12 }
  0x9f   :  { %vm91_vm12 = vcmp.gt.f32.partialorder %v90_v4, %v83_v7  ;;  %v159_v24 = vmul.f32 1000000.0, %v158_v13  ;;  %v176_v25 = vadd.f32 %v175_v61, %v332_v9  ;;  %v117_v28 = vsel %vm116_vm14, -inf, %v228_v3 }
  0xa0   :  { %v92_v14 = vsel %vm91_vm12, %v90_v4, %v83_v7  ;;  %v93_v15 = vsel %vm91_vm12, 5, %v84_v8  ;;  %vm134_vm3 = vcmp.gt.f32.partialorder %v230_v17, 0.0  ;;  %v232_v29 = vround.rtne.f32 %v150_v18 }
  0xa1   :  { %vm100_vm15 = vcmp.gt.f32.partialorder %v99_v16, %v92_v14  ;;  %v168_v30 = vmul.f32 1000000.0, %v167_v19  ;;  %v126_v33 = vsel %vm125_vm0, -inf, %v229_v10  ;;  %vm143_vm5 = vcmp.gt.f32.partialorder %v231_v23, 0.0 }
  0xa2   :  { %v101_v20 = vsel %vm100_vm15, %v99_v16, %v92_v14  ;;  %v102_v21 = vsel %vm100_vm15, 6, %v93_v15  ;;  %v233_v34 = vround.rtne.f32 %v159_v24  ;;  %v177_v35 = vmul.f32 1000000.0, %v176_v25 }
  0xa3   :  { %vm109_vm1 = vcmp.gt.f32.partialorder %v108_v22, %v101_v20  ;;  %v135_v38 = vsel %vm134_vm3, -inf, %v230_v17  ;;  %vm152_vm7 = vcmp.gt.f32.partialorder %v232_v29, 0.0  ;;  %v234_v39 = vround.rtne.f32 %v168_v30 }
  0xa4   :  { %v110_v26 = vsel %vm109_vm1, %v108_v22, %v101_v20  ;;  %v111_v27 = vsel %vm109_vm1, 7, %v102_v21  ;;  %v144_v42 = vsel %vm143_vm5, -inf, %v231_v23  ;;  %vm161_vm9 = vcmp.gt.f32.partialorder %v233_v34, 0.0 }
  0xa5   :  { %vm118_vm2 = vcmp.gt.f32.partialorder %v117_v28, %v110_v26  ;;  %v235_v43 = vround.rtne.f32 %v177_v35  ;;  %v153_v46 = vsel %vm152_vm7, -inf, %v232_v29  ;;  %vm170_vm11 = vcmp.gt.f32.partialorder %v234_v39, 0.0 }
  0xa6   :  { %v119_v31 = vsel %vm118_vm2, %v117_v28, %v110_v26  ;;  %v120_v32 = vsel %vm118_vm2, 8, %v111_v27  ;;  %v162_v49 = vsel %vm161_vm9, -inf, %v233_v34  ;;  %v171_v52 = vsel %vm170_vm11, -inf, %v234_v39 }
  0xa7   :  { %vm127_vm4 = vcmp.gt.f32.partialorder %v126_v33, %v119_v31  ;;  %vm179_vm13 = vcmp.gt.f32.partialorder %v235_v43, 0.0  ;;  %vm189_vm15 = vcmask 60416  }
  0xa8   :  { %v128_v36 = vsel %vm127_vm4, %v126_v33, %v119_v31  ;;  %v129_v37 = vsel %vm127_vm4, 9, %v120_v32  ;;  %v180_v55 = vsel %vm179_vm13, -inf, %v235_v43 }
  0xa9   :  { %vm136_vm6 = vcmp.gt.f32.partialorder %v135_v38, %v128_v36 }
  0xaa   :  { %v137_v40 = vsel %vm136_vm6, %v135_v38, %v128_v36  ;;  %v138_v41 = vsel %vm136_vm6, 10, %v129_v37 }
  0xab   :  { %vm145_vm8 = vcmp.gt.f32.partialorder %v144_v42, %v137_v40 }
  0xac   :  { %v146_v44 = vsel %vm145_vm8, %v144_v42, %v137_v40  ;;  %v147_v45 = vsel %vm145_vm8, 11, %v138_v41 }
  0xad   :  { %vm154_vm10 = vcmp.gt.f32.partialorder %v153_v46, %v146_v44 }
  0xae   :  { %v155_v47 = vsel %vm154_vm10, %v153_v46, %v146_v44  ;;  %v156_v48 = vsel %vm154_vm10, 12, %v147_v45 }
  0xaf   :  { %vm163_vm12 = vcmp.gt.f32.partialorder %v162_v49, %v155_v47 }
  0xb0   :  { %v164_v50 = vsel %vm163_vm12, %v162_v49, %v155_v47  ;;  %v165_v51 = vsel %vm163_vm12, 13, %v156_v48 }
  0xb1   :  { %vm172_vm14 = vcmp.gt.f32.partialorder %v171_v52, %v164_v50 }
  0xb2   :  { %v173_v53 = vsel %vm172_vm14, %v171_v52, %v164_v50  ;;  %v174_v54 = vsel %vm172_vm14, 14, %v165_v51 }
  0xb3   :  { %vm181_vm0 = vcmp.gt.f32.partialorder %v180_v55, %v173_v53 }
  0xb4   :  { %v182_v56 = vsel %vm181_vm0, 15, %v174_v54 }
  0xb5   :  { %v183_v57 = vcvt.s32.f32 %v182_v56  ;;  %190 = vst.msk [vmem:[#allocation2] sm:$0xf] %vm189_vm15, %v182_v56 }
  0xb6   :  { %254 = shalt.err (!%p251_p4)
}
  0xb7   :  { %s255_s23 = scalar_lea.hbm %s398_s3, 64 }
  0xb8   :  { %p256_p5 = scmp.ne.s32.totalorder %s398_s3, %s255_s23  ;;  %p259_p6 = scmp.lt.u32.totalorder %s255_s23, %s398_s3 }
  0xba   :  { %p261_p7 = pnand %p259_p6, %p256_p5 }
  0xbc   :  { %264 = shalt.err (!%p261_p7)
}
  0xbd   :  { %201 = dma.vmem_to_hbm [thread:$0]  %s199_s2, 64, %s398_s3, [#allocation3]   ;;  %v184_v58 = vmul.f32 %v183_v57, %v327_v6  ;;  %v34_v61 = vpop.permute.xlu1 %33 }
  0xbe   :  { %s293_s30 = smov [#allocation4]  }
  0xbf   :  { %v185_v59 = vadd.f32 %v184_v58, %v332_v9  ;;  %s208_s5 = sshll.u32 %s293_s30, 4  ;;  %s209_s5 = int_to_ptr.vmem [resolvable:$true] %s208_s5 }
  0xc0   :  { %s265_s6 = scalar_lea.vmem %s209_s5, 64  ;;  %p270_p9 = scmp.lt.s32.totalorder %s209_s5, %s209_s5 }
  0xc1   :  { %v186_v60 = vsub.f32 0.0, %v185_v59  ;;  %p266_p8 = scmp.ne.s32.totalorder %s209_s5, %s265_s6  ;;  %p271_p10 = scmp.lt.s32.totalorder %s265_s6, %s265_s6 }
  0xc3   :  { %v187_v62 = vmax.f32 %v186_v60, 0.0  ;;  %p272_p11 = por %p271_p10, %p270_p9 }
  0xc5   :  { %v188_v63 = vmul.f32 %v187_v62, %v34_v61  ;;  %p273_p12 = pnand %p272_p11, %p266_p8 }
  0xc7   :  { %191 = vst.msk [vmem:[#allocation4] sm:$0xf] %vm189_vm15, %v188_v63 }
  0xc8   :  { %276 = shalt.err (!%p273_p12)
}
  0xc9   :  { %s277_s8 = scalar_lea.hbm %s399_s4, 64 }
  0xca   :  { %p278_p13 = scmp.ne.s32.totalorder %s399_s4, %s277_s8  ;;  %p281_p0 = scmp.lt.u32.totalorder %s277_s8, %s399_s4 }
  0xcc   :  { %p283_p1 = pnand %p281_p0, %p278_p13 }
  0xce   :  { %286 = shalt.err (!%p283_p1)
}
  0xcf   :  { %211 = dma.vmem_to_hbm [thread:$0]  %s209_s5, 64, %s399_s4, [#allocation5]  }
  0xd0   :  { %287 = dma.done.wait [#allocation3], 64  }
  0xd1   :  { %288 = vsyncadd [#allocation3], 4294967232 }
  0xd2   :  { %289 = dma.done.wait [#allocation5], 64  }
  0xd3   :  { %290 = vsyncadd [#allocation5], 4294967232 }
  0xd4   :  { %218 = vsyncpa [#allocation3], 1 }
  0xd5   :  { %219 = vsyncpa [#allocation5], 1 }

</bundles_post_ra>
